<compile_context>
chip_gen: v7x
topology: tpu7x:2x2x1
jax: 0.10.0
libtpu: 0.0.40
codegen_flags: <defaults>
</compile_context>

<pallas_src>
import functools

import jax
import jax.numpy as jnp
from jax import lax
from jax.experimental import pallas as pl
from jax.experimental.pallas import tpu as pltpu

INV_SCALE_FACTOR = 4.0
DROPOUT_P = 0.005


def _attn_kernel(q_ref, k_ref, v_ref, r_ref, o_ref, *,
                 inv_scale, dropout_p, keep_threshold):
    # q_ref: (1, Sq, Dk)  k_ref: (1, Sk, Dk)  v_ref: (1, Sk, Dv)
    # r_ref: (1, Sq, Sk) int32 random bits   o_ref: (1, Sq, Dv)

    # Apply the 1/inv_scale factor on the small (Sq, Dk) query tile, not the
    # (Sq, Sk) score tile.
    q = q_ref[0] * jnp.float32(1.0 / inv_scale)   # (Sq, Dk)
    k = k_ref[0]                                  # (Sk, Dk)
    v = v_ref[0]                                  # (Sk, Dv)

    # Scores on the MXU: contract on Dk of both operands -> no explicit k.T.
    qk = lax.dot_general(q, k, (((1,), (1,)), ((), ())),
                         preferred_element_type=jnp.float32)      # (Sq, Sk)

    # Numerically stable softmax numerator; the per-row normalization is a
    # scalar per row and commutes through the contraction over Sk, so it is
    # folded in after the second matmul.
    m = jnp.max(qk, axis=-1, keepdims=True)
    e = jnp.exp(qk - m)
    s = jnp.sum(e, axis=-1, keepdims=True)
    inv = 1.0 / s                                                  # (Sq, 1)

    # Inverted dropout: keep iff bits >= p * 2^31 (bits uniform in [0, 2^31)).
    keep = r_ref[0] >= jnp.int32(keep_threshold)                   # (Sq, Sk) bool
    masked = jnp.where(keep, e, jnp.float32(0.0))                  # un-normalized

    out = jnp.dot(masked, v, preferred_element_type=jnp.float32)   # (Sq, Dv)

    # Fold softmax normalization and the 1/(1-p) dropout scale on the small
    # output tile.
    o_ref[0] = (out * inv * jnp.float32(1.0 / (1.0 - dropout_p))).astype(o_ref.dtype)


def attention_dropout(query, key, value, *, inv_scale=INV_SCALE_FACTOR,
                      dropout_p=DROPOUT_P, rng_key=None):
    # query: (1, Sq, Dk), key: (B, Sk, Dk), value: (B, Sk, Dv)
    _, Sq, Dk = query.shape
    B, Sk, _ = key.shape
    Dv = value.shape[-1]

    if rng_key is None:
        rng_key = jax.random.PRNGKey(0)

    # Uniform int32 bits in [0, 2^31); drop iff bits < p * 2^31  (P(drop) ~= p).
    rand_bits = (jax.random.bits(rng_key, (B, Sq, Sk), jnp.uint32) >> 1).astype(jnp.int32)
    keep_threshold = min(int(round(dropout_p * float(1 << 31))), (1 << 31) - 1)

    kernel = functools.partial(_attn_kernel, inv_scale=inv_scale,
                               dropout_p=dropout_p, keep_threshold=keep_threshold)

    # TODO(synk): for large Sq/Sk this should become a flash-style kernel with
    # Sk tiling + online softmax; at these toy shapes one (Sq, Sk) tile per
    # batch fits trivially in VMEM.
    return pl.pallas_call(
        kernel,
        out_shape=jax.ShapeDtypeStruct((B, Sq, Dv), jnp.float32),
        grid_spec=pltpu.PrefetchScalarGridSpec(
            num_scalar_prefetch=0,
            grid=(B,),
            in_specs=[
                pl.BlockSpec((1, Sq, Dk), lambda b: (0, 0, 0)),  # query broadcast over batch
                pl.BlockSpec((1, Sk, Dk), lambda b: (b, 0, 0)),
                pl.BlockSpec((1, Sk, Dv), lambda b: (b, 0, 0)),
                pl.BlockSpec((1, Sq, Sk), lambda b: (b, 0, 0)),  # dropout bits
            ],
            out_specs=pl.BlockSpec((1, Sq, Dv), lambda b: (b, 0, 0)),
        ),
        compiler_params=pltpu.CompilerParams(
            dimension_semantics=("parallel",)),   # batch iterations are independent
    )(query, key, value, rand_bits)


if __name__ == "__main__":
    rng = jax.random.PRNGKey(0)
    kq, kk, kv, kd = jax.random.split(rng, 4)

    # shapes matching the PyTorch script
    query = jax.random.normal(kq, (1, 5, 3), dtype=jnp.float32)
    key = jax.random.normal(kk, (2, 5, 3), dtype=jnp.float32)
    value = jax.random.normal(kv, (2, 5, 7), dtype=jnp.float32)

    out = attention_dropout(query, key, value, rng_key=kd)
    jax.block_until_ready(out)

    assert out.shape == (2, 5, 7)
    assert out.dtype == jnp.float32
    print("KERNEL_OK")
</pallas_src>

<mosaic_0001>
module attributes {stable_mosaic.version = 11 : i64} {
  func.func @_attn_kernel(%arg0: i32, %arg1: memref<1x5x3xf32, #tpu.memory_space<vmem>>, %arg2: memref<1x5x3xf32, #tpu.memory_space<vmem>>, %arg3: memref<1x5x7xf32, #tpu.memory_space<vmem>>, %arg4: memref<1x5x5xi32, #tpu.memory_space<vmem>>, %arg5: memref<1x5x7xf32, #tpu.memory_space<vmem>>) attributes {dimension_semantics = [#tpu.dimension_semantics<parallel>], iteration_bounds = array<i64: 2>, scalar_prefetch = 0 : i64, scratch_operands = 0 : i64, tpu.core_type = #tpu.core_type<tc>, window_params = [{pipeline_mode = #tpu.pipeline_mode<synchronous>, transform_indices = @transform_0, window_bounds = array<i64: 1, 5, 3>}, {transform_indices = @transform_1, window_bounds = array<i64: 1, 5, 3>}, {transform_indices = @transform_2, window_bounds = array<i64: 1, 5, 7>}, {transform_indices = @transform_3, window_bounds = array<i64: 1, 5, 5>}, {transform_indices = @transform_4, window_bounds = array<i64: 1, 5, 7>}]} {
    %c0 = arith.constant 0 : index
    %c0_0 = arith.constant 0 : index
    %c0_1 = arith.constant 0 : index
    %0 = vector.load %arg1[%c0, %c0_0, %c0_1] : memref<1x5x3xf32, #tpu.memory_space<vmem>>, vector<1x5x3xf32>
    %1 = vector.shape_cast %0 : vector<1x5x3xf32> to vector<5x3xf32>
    %cst = arith.constant 2.500000e-01 : f32
    %2 = vector.broadcast %cst : f32 to vector<5x3xf32>
    %3 = arith.mulf %1, %2 : vector<5x3xf32>
    %c0_2 = arith.constant 0 : index
    %c0_3 = arith.constant 0 : index
    %c0_4 = arith.constant 0 : index
    %4 = vector.load %arg2[%c0_2, %c0_3, %c0_4] : memref<1x5x3xf32, #tpu.memory_space<vmem>>, vector<1x5x3xf32>
    %5 = vector.shape_cast %4 : vector<1x5x3xf32> to vector<5x3xf32>
    %c0_5 = arith.constant 0 : index
    %c0_6 = arith.constant 0 : index
    %c0_7 = arith.constant 0 : index
    %6 = vector.load %arg3[%c0_5, %c0_6, %c0_7] : memref<1x5x7xf32, #tpu.memory_space<vmem>>, vector<1x5x7xf32>
    %7 = vector.shape_cast %6 : vector<1x5x7xf32> to vector<5x7xf32>
    %cst_8 = arith.constant dense<0.000000e+00> : vector<5x5xf32>
    %8 = tpu.matmul %3, %5, %cst_8 {dimension_numbers = #tpu.dot_dimension_numbers<[1], [1], [0], [0], [0, 0, 1, 0], [], []>} : vector<5x3xf32>, vector<5x3xf32>, vector<5x5xf32> -> vector<5x5xf32>
    %cst_9 = arith.constant dense<0xFF800000> : vector<5xf32>
    %9 = vector.multi_reduction <maximumf>, %8, %cst_9 [1] : vector<5x5xf32> to vector<5xf32>
    %10 = vector.shape_cast %9 : vector<5xf32> to vector<5x1xf32>
    %11 = vector.broadcast %10 : vector<5x1xf32> to vector<5x5xf32>
    %12 = arith.subf %8, %11 : vector<5x5xf32>
    %13 = math.exp %12 : vector<5x5xf32>
    %cst_10 = arith.constant dense<0.000000e+00> : vector<5xf32>
    %14 = vector.multi_reduction <add>, %13, %cst_10 [1] : vector<5x5xf32> to vector<5xf32>
    %15 = vector.shape_cast %14 : vector<5xf32> to vector<5x1xf32>
    %cst_11 = arith.constant 1.000000e+00 : f32
    %16 = vector.broadcast %cst_11 : f32 to vector<5x1xf32>
    %17 = arith.divf %16, %15 : vector<5x1xf32>
    %c0_12 = arith.constant 0 : index
    %c0_13 = arith.constant 0 : index
    %c0_14 = arith.constant 0 : index
    %18 = vector.load %arg4[%c0_12, %c0_13, %c0_14] : memref<1x5x5xi32, #tpu.memory_space<vmem>>, vector<1x5x5xi32>
    %19 = vector.shape_cast %18 : vector<1x5x5xi32> to vector<5x5xi32>
    %c10737418_i32 = arith.constant 10737418 : i32
    %20 = vector.broadcast %c10737418_i32 : i32 to vector<5x5xi32>
    %21 = arith.cmpi sge, %19, %20 : vector<5x5xi32>
    %cst_15 = arith.constant 0.000000e+00 : f32
    %22 = vector.broadcast %cst_15 : f32 to vector<5x5xf32>
    %23 = arith.select %21, %13, %22 : vector<5x5xi1>, vector<5x5xf32>
    %cst_16 = arith.constant dense<0.000000e+00> : vector<5x7xf32>
    %24 = tpu.matmul %23, %7, %cst_16 {dimension_numbers = #tpu.dot_dimension_numbers<[1], [0], [0], [1], [0, 0, 1, 1], [], []>} : vector<5x5xf32>, vector<5x7xf32>, vector<5x7xf32> -> vector<5x7xf32>
    %25 = vector.broadcast %17 : vector<5x1xf32> to vector<5x7xf32>
    %26 = arith.mulf %24, %25 : vector<5x7xf32>
    %cst_17 = arith.constant 1.00502515 : f32
    %27 = vector.broadcast %cst_17 : f32 to vector<5x7xf32>
    %28 = arith.mulf %26, %27 : vector<5x7xf32>
    %c0_18 = arith.constant 0 : index
    %c0_19 = arith.constant 0 : index
    %c0_20 = arith.constant 0 : index
    %29 = vector.load %arg5[%c0_18, %c0_19, %c0_20] : memref<1x5x7xf32, #tpu.memory_space<vmem>>, vector<1x5x7xf32>
    %30 = vector.shape_cast %29 : vector<1x5x7xf32> to vector<5x7xf32>
    %31 = vector.shape_cast %28 : vector<5x7xf32> to vector<1x5x7xf32>
    tpu.vector_store %arg5[%c0_18, %c0_19, %c0_20], %31 {strides = array<i32>} : memref<1x5x7xf32, #tpu.memory_space<vmem>>, vector<1x5x7xf32>,
    return
  }
  func.func @transform_0(%arg0: i32) -> (i32, i32, i32) {
    %c0_i32 = arith.constant 0 : i32
    %c0_i32_0 = arith.constant 0 : i32
    %c0_i32_1 = arith.constant 0 : i32
    %c0_i32_2 = arith.constant 0 : i32
    return %c0_i32, %c0_i32_0, %c0_i32_1 : i32, i32, i32
  }
  func.func @transform_1(%arg0: i32) -> (i32, i32, i32) {
    %c0_i32 = arith.constant 0 : i32
    %c0_i32_0 = arith.constant 0 : i32
    %c0_i32_1 = arith.constant 0 : i32
    return %arg0, %c0_i32, %c0_i32_0 : i32, i32, i32
  }
  func.func @transform_2(%arg0: i32) -> (i32, i32, i32) {
    %c0_i32 = arith.constant 0 : i32
    %c0_i32_0 = arith.constant 0 : i32
    %c0_i32_1 = arith.constant 0 : i32
    return %arg0, %c0_i32, %c0_i32_0 : i32, i32, i32
  }
  func.func @transform_3(%arg0: i32) -> (i32, i32, i32) {
    %c0_i32 = arith.constant 0 : i32
    %c0_i32_0 = arith.constant 0 : i32
    %c0_i32_1 = arith.constant 0 : i32
    return %arg0, %c0_i32, %c0_i32_0 : i32, i32, i32
  }
  func.func @transform_4(%arg0: i32) -> (i32, i32, i32) {
    %c0_i32 = arith.constant 0 : i32
    %c0_i32_0 = arith.constant 0 : i32
    %c0_i32_1 = arith.constant 0 : i32
    return %arg0, %c0_i32, %c0_i32_0 : i32, i32, i32
  }
}

</mosaic_0001>

<bundles_post_ra>
// kernel: tpu_custom_call.1
= control target key start
LH: loop header
LB: loop body
LE: loop exit
PB: predicated region body
PF: predicated region fallthrough
CT: control target
= control target key end

     0   :  { %s560_s15 = smov 0   ;;  %s594_s0 = inlined_call_operand.vmem [shape: f32[1,5,3], index: 0, kind: input, shape index: {}]   ;;  %s595_s1 = inlined_call_operand.vmem [shape: f32[2,5,3], index: 1, kind: input, shape index: {}]   ;;  %s596_s2 = inlined_call_operand.vmem [shape: f32[2,5,7], index: 2, kind: input, shape index: {}]   ;;  %s597_s3 = inlined_call_operand.vmem [shape: s32[2,5,5], index: 3, kind: input, shape index: {}]   ;;  %s598_s4 = inlined_call_operand.vmem [shape: f32[2,5,7], index: 4, kind: output, shape index: {}]  }
   0x1 LB: > { %s482_s16 = sadd.s32 4294967295, %s531_s15   ;;  %p486_p0 = scmp.ge.s32.totalorder %s531_s15, 1  ;;  %s531_s15 = sphi %s560_s15, %s14_s15  }
   0x2   : > { %p179_p1 = scmp.lt.s32.totalorder %s531_s15, 3 }
   0x4   : > { %p180_p2 = pnand %p486_p0, %p179_p1 }
   0x5   : > { %p211_p3 = scmp.lt.s32.totalorder (!%p180_p2), %s482_s16, 1  ;;  %v533_v0 = vmov (!%p180_p2), 0.0   ;;  %vm534_vm0 = vmmov (!%p180_p2), 0   ;;  %v227_v1 = vld [vmem:[%s594_s0] sm:$0x1f] (!%p180_p2)  ;;  %vm231_vm1 = vcmask (!%p180_p2), 23552  }
   0x6   : > { %183 = sbr.rel (%p180_p2) target bundleno = 608 (0x260), region = 36  ;;  %501 = vmatprep.subr.mxu0 (!%p180_p2), %v533_v0  ;;  %503 = vmatprep.mubr.msk.f32.mxu0 (!%p180_p2), %vm534_vm0, %v533_v0  ;;  %v228_v3 = vmul.f32 (!%p180_p2), 0.25, %v227_v1  ;;  %vm308_vm2 = vcmask (!%p180_p2), 36864   ;;  %vm327_vm3 = vcmask (!%p180_p2), 1044480   ;;  %vm323_vm5 = vcmask (!%p180_p2), 39936  }
   0x7   : > { %506 = vmatprep.subr.mxu1 (!%p180_p2), %v533_v0  ;;  %508 = vmatprep.mubr.msk.f32.mxu1 (!%p180_p2), %vm534_vm0, %v533_v0  ;;  %vm403_vm6 = vcmask (!%p180_p2), 53248  }
   0xd   : > { %s600_s16 = smov (!%p211_p3, %s482_s16), 1 }
   0xe   : > { %s571_s19 = sshll.u32 %s600_s16, 3 }
   0xf   : > { %s214_s22 = scalar_lea.vmem %s595_s1, %s571_s19  ;;  %s218_s25 = scalar_lea.vmem %s596_s2, %s571_s19 }
  0x10   : > { %v229_v2 = vld [vmem:[%s214_s22] sm:$0x1f]  ;;  %s222_s28 = scalar_lea.vmem %s597_s3, %s571_s19  ;;  %s226_s5 = scalar_lea.vmem %s598_s4, %s571_s19 }
  0x11   : > { %502 = vmatpush3.xpose.msk.msra.mxu0 %vm231_vm1, %v229_v2  ;;  %v230_v7 = vld [vmem:[%s218_s25] sm:$0x1f] }
  0x12   : > { %507 = vmatpush3.msk.msra.mxu1 %vm327_vm3, %v230_v7  ;;  %v320_v11 = vld [vmem:[%s222_s28] sm:$0x1f] }
  0x13   : > { %vm321_vm4 = vcmp.ge.s32.totalorder %v320_v11, 10737418 }
  0x14   : > { %504 = vmatmul.mubr.msk.f32.vlgmr.msra.gmra.mrb[0].mxu0 %vm231_vm1, %v228_v3 }
  0xe7   : > { %v304_v4 = vpop.f32.mrb[0].mxu0 }
  0xe8   : > { %v505_v5 = vpop.f32.mrb[1].mxu0  ;;  %v309_v6 = vsel %vm308_vm2, %v304_v4, -inf }
  0xe9   : > { %310 = vmax.xlane.f32.xlu0 %v309_v6 }
 0x176   : > { %v311_v8 = vpop.xlane.xlu0 %310 }
 0x177   : > { %v312_v9 = vsub.f32 %v304_v4, %v311_v8 }
 0x179   : > { %v313_v10 = vmul.f32 1.442695, %v312_v9 }
 0x17b   : > { %521 = vpow2.f32 %v313_v10 }
 0x185   : > { %v522_v12 = vpop.eup %521 }
 0x186   : > { %v322_v13 = vsel %vm321_vm4, %v522_v12, 0.0  ;;  %v315_v14 = vsel %vm308_vm2, %v522_v12, 0.0 }
 0x187   : > { %509 = vmatmul.mubr.msk.f32.vlgmr.msra.gmra.mrb[0].mxu1 %vm323_vm5, %v322_v13  ;;  %316 = vadd.xlane.f32.xlu0 %v315_v14 }
 0x214   : > { %v317_v15 = vpop.xlane.xlu0 %316 }
 0x215   : > { %523 = vrcp.f32 %v317_v15 }
 0x21f   : > { %v524_v16 = vpop.eup %523 }
 0x25a   : > { %v397_v17 = vpop.f32.mrb[0].mxu1 }
 0x25b   : > { %v401_v18 = vmul.f32 %v524_v16, %v397_v17  ;;  %v510_v19 = vpop.f32.mrb[1].mxu1 }
 0x25d   : > { %v402_v20 = vmul.f32 1.0050251, %v401_v18 }
 0x25f   : > { %404 = vst.msk [vmem:[%s226_s5] sm:$0x1f] %vm403_vm6, %v402_v20 }
 0x260 PF: > { %s14_s15 = sadd.s32 1, %s531_s15  }
 0x261   : > { %p11_p4 = scmp.ge.s32.totalorder %s14_s15, 4  }
 0x263   :  { %13 = sbr.rel (!%p11_p4) target bundleno = 1 (0x1), region = 72 }

</bundles_post_ra>
